<compile_context>
chip_gen: v6e
topology: v6e:2x2x1
jax: 0.10.0
libtpu: 0.0.40
codegen_flags: <defaults>
</compile_context>

<pallas_src>
import math
import functools

import jax
import jax.numpy as jnp
from jax.experimental import pallas as pl
from jax.experimental.pallas import tpu as pltpu


def _round_up(x: int, m: int) -> int:
    return ((x + m - 1) // m) * m


def _pick_lane_tile(padded_dim: int, t_max: int) -> int:
    """Largest multiple of 128 that divides padded_dim (a 128-multiple) and <= t_max."""
    if padded_dim <= t_max:
        return padded_dim
    best = 128
    t = 256
    while t <= t_max:
        if padded_dim % t == 0:
            best = t
        t += 128
    return best


# --------------------------------------------------------------------------- #
# Kernel: y[tm, tn] = sum_k x[tm, tk] @ Wkn[tk, tn]  (+ bias on the last K step)
# --------------------------------------------------------------------------- #
def _sparse_linear_kernel(x_ref, w_ref, b_ref, o_ref, acc_ref):
    k = pl.program_id(2)

    @pl.when(k == 0)
    def _():
        acc_ref[...] = jnp.zeros_like(acc_ref)

    # K-major weight: standard (tm,tk)@(tk,tn) contraction, no operand transpose.
    acc_ref[...] += jnp.dot(
        x_ref[...], w_ref[...], preferred_element_type=jnp.float32
    )

    @pl.when(k == pl.num_programs(2) - 1)
    def _():
        # Bias added exactly once, at finalize.
        o_ref[...] = (acc_ref[...] + b_ref[...]).astype(o_ref.dtype)


# --------------------------------------------------------------------------- #
# One-time weight preparation (outside the per-call hot path)
# --------------------------------------------------------------------------- #
def prepare_sparse_linear_params(weight, bias, *, compute_dtype=jnp.bfloat16):
    """weight: (out_dim, in_dim), bias: (out_dim,).

    Returns:
      w_kn : (K_pad, N_pad) compute_dtype  -- K-major, 128-padded weight
      b_row: (1, N_pad)     float32        -- padded bias row
    """
    out_dim, in_dim = weight.shape
    K_pad = _round_up(in_dim, 128)
    N_pad = _round_up(out_dim, 128)
    w_kn = jnp.pad(
        weight.T.astype(compute_dtype),
        ((0, K_pad - in_dim), (0, N_pad - out_dim)),
    )
    b_row = jnp.pad(bias.astype(jnp.float32), (0, N_pad - out_dim)).reshape(1, N_pad)
    return w_kn, b_row


# --------------------------------------------------------------------------- #
# Forward
# --------------------------------------------------------------------------- #
@functools.partial(
    jax.jit,
    static_argnames=(
        "out_dim", "tm_max", "tn_max", "tk_max", "out_dtype", "allow_xla_fallback",
    ),
)
def sparse_linear_forward(
    x, w_kn, b_row, *, out_dim,
    tm_max=512, tn_max=512, tk_max=512,
    out_dtype=None, allow_xla_fallback=True,
):
    """x: (B, in_dim); w_kn/b_row from prepare_sparse_linear_params."""
    B, in_dim = x.shape
    K_pad, N_pad = w_kn.shape
    assert b_row.shape == (1, N_pad)
    assert K_pad >= in_dim and N_pad >= out_dim
    out_dtype = x.dtype if out_dtype is None else out_dtype
    elt = jnp.dtype(w_kn.dtype).itemsize
    out_elt = jnp.dtype(out_dtype).itemsize

    # Tiny layers: pallas_call + padding overhead beats the matmul itself.
    if allow_xla_fallback and (B * K_pad * N_pad) < (128 * 128 * 256):
        y = jnp.dot(
            x.astype(w_kn.dtype), w_kn[:in_dim, :out_dim],
            preferred_element_type=jnp.float32,
        )
        return (y + b_row[0, :out_dim]).astype(out_dtype)

    # ---- tile sizes -------------------------------------------------------
    tm_max = _round_up(tm_max, 16)
    n_m_tiles = -(-B // tm_max)                       # ceil
    tm = min(_round_up(-(-B // n_m_tiles), 16), tm_max)   # >=16 rows (bf16 packing)
    M_pad = tm * n_m_tiles

    tn = _pick_lane_tile(N_pad, tn_max)
    tk = _pick_lane_tile(K_pad, tk_max)

    grid_m = M_pad // tm
    grid_n = N_pad // tn
    # v7x has 2 TensorCores: make sure the parallel axes expose >= 2 tiles.
    if grid_m * grid_n == 1 and N_pad >= 256:
        tn = _pick_lane_tile(N_pad, N_pad // 2)
        grid_n = N_pad // tn
    grid_k = K_pad // tk
    grid = (grid_m, grid_n, grid_k)

    # ---- per-call activation pad/cast (only x; weight is pre-prepared) ----
    x_p = jnp.pad(x.astype(w_kn.dtype), ((0, M_pad - B), (0, K_pad - in_dim)))

    # ---- VMEM budget: double-buffered tiles + resident f32 accumulator ----
    tile_bytes = (tm * tk * elt       # x tile
                  + tk * tn * elt     # W tile
                  + tn * 4            # bias row
                  + tm * tn * out_elt)  # output tile
    vmem_needed = 2 * tile_bytes + tm * tn * 4
    vmem_limit = int(min(vmem_needed + (16 << 20), 48 << 20))  # safe on 64 MiB v7x

    cost = pl.CostEstimate(
        flops=2 * M_pad * N_pad * K_pad,
        bytes_accessed=(
            grid_n * M_pad * K_pad * elt      # x re-read once per N tile
            + grid_m * K_pad * N_pad * elt    # W re-read once per M tile
            + N_pad * 4                       # bias
            + M_pad * N_pad * out_elt         # output writeback
        ),
        transcendentals=0,
    )

    y_pad = pl.pallas_call(
        _sparse_linear_kernel,
        out_shape=jax.ShapeDtypeStruct((M_pad, N_pad), out_dtype),
        grid_spec=pltpu.PrefetchScalarGridSpec(
            num_scalar_prefetch=0,
            grid=grid,
            in_specs=[
                pl.BlockSpec((tm, tk), lambda i, j, k: (i, k)),   # x tile
                pl.BlockSpec((tk, tn), lambda i, j, k: (k, j)),   # W tile (K-major)
                pl.BlockSpec((1, tn), lambda i, j, k: (0, j)),    # bias row
            ],
            out_specs=pl.BlockSpec((tm, tn), lambda i, j, k: (i, j)),
            scratch_shapes=[pltpu.VMEM((tm, tn), jnp.float32)],
        ),
        compiler_params=pltpu.CompilerParams(
            dimension_semantics=("parallel", "parallel", "arbitrary"),
            vmem_limit_bytes=vmem_limit,
        ),
        cost_estimate=cost,
    )(x_p, w_kn, b_row)

    return y_pad[:B, :out_dim]


# --------------------------------------------------------------------------- #
# Parameter construction mirroring SparseLinear.__init__
# --------------------------------------------------------------------------- #
def make_sparse_linear_params(key, in_dim, out_dim):
    k_m, k_w, k_b = jax.random.split(key, 3)

    # Sparsity pattern m: (in_dim, out_dim); keep weight[out, in] where m[in, out] == 1.
    m = (jax.random.uniform(k_m, (in_dim, out_dim)) < 0.5).astype(jnp.float32)

    # truncated_normal_(weight, mean=0, std=0.1): normal clipped to (-2, 2) then * 0.1
    w = jax.random.truncated_normal(k_w, -2.0, 2.0, (out_dim, in_dim), jnp.float32) * 0.1

    # bias ~ Uniform(-1/sqrt(fan_in), 1/sqrt(fan_in)), fan_in = in_dim
    bound = 1.0 / math.sqrt(in_dim)
    b = jax.random.uniform(k_b, (out_dim,), jnp.float32, -bound, bound)

    # Apply the sparsity mask to the weight (as done at __init__ time).
    w = w * m.T  # (out_dim, in_dim)
    return w, b, m
    # TODO(synk): backward_hook (gradient masking during training) has no
    # forward-pass equivalent; only the masked-at-init weights matter here.


if __name__ == "__main__":
    key = jax.random.PRNGKey(0)
    k_params, k_x = jax.random.split(key)

    batch, in_dim, out_dim = 8, 32, 16
    weight, bias, m = make_sparse_linear_params(k_params, in_dim, out_dim)
    x = jax.random.normal(k_x, (batch, in_dim), jnp.float32)

    # One-time weight preparation (off the per-call hot path).
    w_kn, b_row = prepare_sparse_linear_params(weight, bias)

    # Force the Pallas path (the demo shapes would otherwise hit the tiny-layer fallback).
    y = sparse_linear_forward(
        x, w_kn, b_row, out_dim=out_dim, allow_xla_fallback=False
    )
    y = jax.block_until_ready(y)

    # Reference with the same bf16-operand / f32-accumulate numerics.
    x_bf = x.astype(jnp.bfloat16).astype(jnp.float32)
    w_bf = weight.astype(jnp.bfloat16).astype(jnp.float32)
    y_ref = x_bf @ w_bf.T + bias

    assert y.shape == (batch, out_dim)
    assert jnp.allclose(y, y_ref, atol=1e-3, rtol=1e-3), float(jnp.max(jnp.abs(y - y_ref)))
    # Sanity against pure-f32 math as well (loose, bf16 rounding).
    y_f32 = x @ weight.T + bias
    assert jnp.allclose(y, y_f32, atol=5e-2, rtol=5e-2)

    print("KERNEL_OK")
</pallas_src>

<mosaic_0001>
module attributes {stable_mosaic.version = 11 : i64} {
  func.func @_sparse_linear_kernel(%arg0: i32, %arg1: i32, %arg2: i32, %arg3: memref<16x128xbf16, #tpu.memory_space<vmem>>, %arg4: memref<128x128xbf16, #tpu.memory_space<vmem>>, %arg5: memref<1x128xf32, #tpu.memory_space<vmem>>, %arg6: memref<16x128xf32, #tpu.memory_space<vmem>>, %arg7: memref<16x128xf32, #tpu.memory_space<vmem>>) attributes {dimension_semantics = [#tpu.dimension_semantics<parallel>, #tpu.dimension_semantics<parallel>, #tpu.dimension_semantics<arbitrary>], iteration_bounds = array<i64: 1, 1, 1>, scalar_prefetch = 0 : i64, scratch_operands = 1 : i64, tpu.core_type = #tpu.core_type<tc>, window_params = [{transform_indices = @transform_0, window_bounds = array<i64: 16, 128>}, {transform_indices = @transform_1, window_bounds = array<i64: 128, 128>}, {transform_indices = @transform_2, window_bounds = array<i64: 1, 128>}, {transform_indices = @transform_3, window_bounds = array<i64: 16, 128>}]} {
    %c0_i32 = arith.constant 0 : i32
    %0 = arith.cmpi eq, %arg2, %c0_i32 : i32
    %1 = arith.extui %0 : i1 to i32
    %c0_i32_0 = arith.constant 0 : i32
    %2 = arith.cmpi ne, %1, %c0_i32_0 : i32
    scf.if %2 {
      %cst_10 = arith.constant 0.000000e+00 : f32
      %12 = vector.broadcast %cst_10 : f32 to vector<16x128xf32>
      %c0_11 = arith.constant 0 : index
      %c0_12 = arith.constant 0 : index
      %13 = vector.load %arg7[%c0_11, %c0_12] : memref<16x128xf32, #tpu.memory_space<vmem>>, vector<16x128xf32>
      tpu.vector_store %arg7[%c0_11, %c0_12], %12 {strides = array<i32>} : memref<16x128xf32, #tpu.memory_space<vmem>>, vector<16x128xf32>,
    } else {
    }
    %c0 = arith.constant 0 : index
    %c0_1 = arith.constant 0 : index
    %3 = vector.load %arg7[%c0, %c0_1] : memref<16x128xf32, #tpu.memory_space<vmem>>, vector<16x128xf32>
    %c0_2 = arith.constant 0 : index
    %c0_3 = arith.constant 0 : index
    %4 = vector.load %arg3[%c0_2, %c0_3] : memref<16x128xbf16, #tpu.memory_space<vmem>>, vector<16x128xbf16>
    %c0_4 = arith.constant 0 : index
    %c0_5 = arith.constant 0 : index
    %5 = vector.load %arg4[%c0_4, %c0_5] : memref<128x128xbf16, #tpu.memory_space<vmem>>, vector<128x128xbf16>
    %cst = arith.constant dense<0.000000e+00> : vector<16x128xf32>
    %6 = tpu.matmul %4, %5, %cst {dimension_numbers = #tpu.dot_dimension_numbers<[1], [0], [0], [1], [0, 0, 1, 1], [], []>} : vector<16x128xbf16>, vector<128x128xbf16>, vector<16x128xf32> -> vector<16x128xf32>
    %7 = arith.addf %3, %6 : vector<16x128xf32>
    %c0_6 = arith.constant 0 : index
    %c0_7 = arith.constant 0 : index
    %8 = vector.load %arg7[%c0_6, %c0_7] : memref<16x128xf32, #tpu.memory_space<vmem>>, vector<16x128xf32>
    tpu.vector_store %arg7[%c0_6, %c0_7], %7 {strides = array<i32>} : memref<16x128xf32, #tpu.memory_space<vmem>>, vector<16x128xf32>,
    %c0_i32_8 = arith.constant 0 : i32
    %9 = arith.cmpi eq, %arg2, %c0_i32_8 : i32
    %10 = arith.extui %9 : i1 to i32
    %c0_i32_9 = arith.constant 0 : i32
    %11 = arith.cmpi ne, %10, %c0_i32_9 : i32
    scf.if %11 {
      %c0_10 = arith.constant 0 : index
      %c0_11 = arith.constant 0 : index
      %12 = vector.load %arg7[%c0_10, %c0_11] : memref<16x128xf32, #tpu.memory_space<vmem>>, vector<16x128xf32>
      %c0_12 = arith.constant 0 : index
      %c0_13 = arith.constant 0 : index
      %13 = vector.load %arg5[%c0_12, %c0_13] : memref<1x128xf32, #tpu.memory_space<vmem>>, vector<1x128xf32>
      %14 = vector.broadcast %13 : vector<1x128xf32> to vector<16x128xf32>
      %15 = arith.addf %12, %14 : vector<16x128xf32>
      %c0_14 = arith.constant 0 : index
      %c0_15 = arith.constant 0 : index
      %16 = vector.load %arg6[%c0_14, %c0_15] : memref<16x128xf32, #tpu.memory_space<vmem>>, vector<16x128xf32>
      tpu.vector_store %arg6[%c0_14, %c0_15], %15 {strides = array<i32>} : memref<16x128xf32, #tpu.memory_space<vmem>>, vector<16x128xf32>,
    } else {
    }
    return
  }
  func.func @transform_0(%arg0: i32, %arg1: i32, %arg2: i32) -> (i32, i32) {
    %c0_i32 = arith.constant 0 : i32
    return %arg0, %arg2 : i32, i32
  }
  func.func @transform_1(%arg0: i32, %arg1: i32, %arg2: i32) -> (i32, i32) {
    %c0_i32 = arith.constant 0 : i32
    return %arg2, %arg1 : i32, i32
  }
  func.func @transform_2(%arg0: i32, %arg1: i32, %arg2: i32) -> (i32, i32) {
    %c0_i32 = arith.constant 0 : i32
    %c0_i32_0 = arith.constant 0 : i32
    return %c0_i32, %arg1 : i32, i32
  }
  func.func @transform_3(%arg0: i32, %arg1: i32, %arg2: i32) -> (i32, i32) {
    %c0_i32 = arith.constant 0 : i32
    return %arg0, %arg1 : i32, i32
  }
}

</mosaic_0001>

<bundles_post_ra>
// kernel: sparse_linear_forward.1
= control target key start
LH: loop header
LB: loop body
LE: loop exit
PB: predicated region body
PF: predicated region fallthrough
CT: control target
= control target key end

     0   :  { %8 = vsyncpa [#allocation4], 0  ;;  %s250_s12 = smov [#allocation3]   ;;  %s290_s0 = inlined_call_operand.vmem [shape: bf16[16,128], index: 0, kind: input, shape index: {}]   ;;  %s291_s1 = inlined_call_operand.hbm [shape: bf16[128,128], index: 1, kind: input, shape index: {}]   ;;  %s292_s2 = inlined_call_operand.vmem [shape: f32[1,128], index: 2, kind: input, shape index: {}]   ;;  %s293_s3 = inlined_call_operand.vmem [shape: f32[16,128], index: 3, kind: output, shape index: {}]  }
   0x1   :  { %s16_s13 = sshll.u32 %s250_s12, 4  ;;  %s17_s13 = int_to_ptr.vmem [resolvable:$true] %s16_s13 }
   0x2   :  { %s236_s14 = scalar_lea.vmem %s17_s13, 1024  ;;  %p241_p1 = scmp.lt.s32.totalorder %s17_s13, %s17_s13 }
   0x3   :  { %p237_p0 = scmp.ne.s32.totalorder %s17_s13, %s236_s14  ;;  %p242_p2 = scmp.lt.s32.totalorder %s236_s14, %s236_s14 }
   0x5   :  { %p243_p3 = por %p242_p2, %p241_p1 }
   0x7   :  { %p244_p4 = pnand %p243_p3, %p237_p0 }
   0x9   :  { %247 = shalt.err (!%p244_p4)
}
   0xa   :  { %s251_s15 = smov 64   ;;  %s252_s16 = smov 4  }
   0xb   :  { %22 = dma.hbm_to_vmem [thread:$0]  %s291_s1, 1024, %s17_s13, [#allocation4], %s251_s15, %s251_s15, %s252_s16  }
   0xc   :  { %248 = dma.done.wait [#allocation4], 1024  }
   0xd   :  { %249 = vsyncadd [#allocation4], 4294966272  ;;  %v253_v0 = vmov 0.0   ;;  %vm254_vm0 = vmmov 0   ;;  %v219_v1 = vld [vmem:[#allocation3 + $0x38] sm:$0xff]   ;;  %v220_v2 = vld [vmem:[#allocation3 + $0x30] sm:$0xff]  }
   0xe   :  { %194 = vmatprep.subr.bf16.mxu0 %v253_v0  ;;  %210 = vmatprep.mubr.msk.bf16.mxu0 %vm254_vm0, %v253_v0  ;;  %v221_v3 = vld [vmem:[#allocation3 + $0x28] sm:$0xff]   ;;  %v222_v4 = vld [vmem:[#allocation3 + $0x20] sm:$0xff]   ;;  %v223_v5 = vld [vmem:[#allocation3 + $0x18] sm:$0xff]  }
   0xf   :  { %195 = vmatpush3.bf16.msra.mxu0 %v219_v1  ;;  %v224_v6 = vld [vmem:[#allocation3 + $0x10] sm:$0xff]   ;;  %v225_v7 = vld [vmem:[#allocation3 + $0x8] sm:$0xff]   ;;  %v226_v8 = vld [vmem:[#allocation3] sm:$0xff]  }
  0x10   :  { %196 = vmatprep.subr.bf16.mxu0 %v253_v0  ;;  %v227_v9 = vld [vmem:[%s290_s0] sm:$0xff]  }
  0x11   :  { %v184_v10 = vld [vmem:[%s292_s2] ss:$0 sm:$0xff] }
  0x13   :  { %197 = vmatpush3.bf16.msra.mxu0 %v220_v2 }
  0x14   :  { %198 = vmatprep.subr.bf16.mxu0 %v253_v0 }
  0x17   :  { %199 = vmatpush3.bf16.msra.mxu0 %v221_v3 }
  0x18   :  { %200 = vmatprep.subr.bf16.mxu0 %v253_v0 }
  0x1b   :  { %201 = vmatpush3.bf16.msra.mxu0 %v222_v4 }
  0x1c   :  { %202 = vmatprep.subr.bf16.mxu0 %v253_v0 }
  0x1f   :  { %203 = vmatpush3.bf16.msra.mxu0 %v223_v5 }
  0x20   :  { %204 = vmatprep.subr.bf16.mxu0 %v253_v0 }
  0x23   :  { %205 = vmatpush3.bf16.msra.mxu0 %v224_v6 }
  0x24   :  { %206 = vmatprep.subr.bf16.mxu0 %v253_v0 }
  0x27   :  { %207 = vmatpush3.bf16.msra.mxu0 %v225_v7 }
  0x28   :  { %208 = vmatprep.subr.bf16.mxu0 %v253_v0 }
  0x2b   :  { %209 = vmatpush3.bf16.msra.mxu0 %v226_v8 }
  0x2e   :  { %211 = vmatmul.mubr.bf16.vlgmr.msra.gmra.mxu0 %v227_v9 }
  0xee   :  { %v143_v11 = vpop.f32.mrf.mxu0 }
  0xef   :  { %v166_v12 = vadd.f32 %v184_v10, %v143_v11 }
  0xf0   :  { %v212_v13 = vpop.f32.mrf.mxu0 }
  0xf1   :  { %168 = vst [vmem:[%s293_s3] sm:$0xff] %v166_v12 }
  0xf2   :  { %v146_v14 = vpop.f32.mrf.mxu0 }
  0xf3   :  { %v167_v15 = vadd.f32 %v184_v10, %v146_v14 }
  0xf4   :  { %v213_v16 = vpop.f32.mrf.mxu0 }
  0xf5   :  { %169 = vst [vmem:[%s293_s3 + $0x8] sm:$0xff] %v167_v15 }
  0xf6   :  { %174 = vsyncpa [#allocation4], 1 }

</bundles_post_ra>
